<compile_context>
chip_gen: v7x
topology: tpu7x:2x2x1
jax: 0.10.0
libtpu: 0.0.40
codegen_flags: <defaults>
</compile_context>

<pallas_src>
import jax
import jax.numpy as jnp
from jax.experimental import pallas as pl
from jax.experimental.pallas import tpu as pltpu


# ----------------------------------------------------------------------------
# helpers
# ----------------------------------------------------------------------------
def _round_up(x, m):
    return ((x + m - 1) // m) * m


def _pick_v_tile(H, V, itemsize, target_bytes):
    """Largest multiple-of-128 divisor of V whose W tile is <= target_bytes."""
    if V <= 128 or V % 128 != 0:
        return V
    max_cols = max(128, target_bytes // (H * itemsize))
    best = 128
    t = 128
    upper = min(V, max_cols)
    while t <= upper:
        if V % t == 0:
            best = t
        t += 128
    return best


def _online_lse_step(logits, m_sc, l_sc):
    """Flash-style running (max, sum) update over one [t_b, v_tile] tile."""
    m_prev = m_sc[...]
    m_new = jnp.maximum(m_prev, jnp.max(logits, axis=-1, keepdims=True))
    l_sc[...] = (l_sc[...] * jnp.exp(m_prev - m_new)
                 + jnp.sum(jnp.exp(logits - m_new), axis=-1, keepdims=True))
    m_sc[...] = m_new


# ----------------------------------------------------------------------------
# kernels
# ----------------------------------------------------------------------------
def _lse_kernel(pooled_ref, w_ref, lse_ref, m_sc, l_sc):
    # pooled_ref: [t_b, H]   bf16 (resident across the vocab axis)
    # w_ref:      [H, tV]    bf16 (streamed LM-head tile)
    # lse_ref:    [t_b, 1]   f32  (written once, at the last vocab tile)
    v = pl.program_id(2)

    @pl.when(v == 0)
    def _init():
        m_sc[...] = jnp.full_like(m_sc, -jnp.inf)
        l_sc[...] = jnp.zeros_like(l_sc)

    logits = jnp.dot(pooled_ref[...], w_ref[...],
                     preferred_element_type=jnp.float32)
    _online_lse_step(logits, m_sc, l_sc)

    @pl.when(v == pl.num_programs(2) - 1)
    def _finalize():
        lse_ref[...] = m_sc[...] + jnp.log(l_sc[...])


def _logits_lse_kernel(pooled_ref, w_ref, logits_ref, lse_ref, m_sc, l_sc):
    # Full-vocab variant: also streams the raw logits back (lane-dense
    # [t_b, tV] blocks); normalization happens outside.
    v = pl.program_id(2)

    @pl.when(v == 0)
    def _init():
        m_sc[...] = jnp.full_like(m_sc, -jnp.inf)
        l_sc[...] = jnp.zeros_like(l_sc)

    logits = jnp.dot(pooled_ref[...], w_ref[...],
                     preferred_element_type=jnp.float32)
    logits_ref[...] = logits
    _online_lse_step(logits, m_sc, l_sc)

    @pl.when(v == pl.num_programs(2) - 1)
    def _finalize():
        lse_ref[...] = m_sc[...] + jnp.log(l_sc[...])


# ----------------------------------------------------------------------------
# pallas_call wrapper
# ----------------------------------------------------------------------------
def _stream_lse(pooled, w, *, v_tile=None, with_logits=False,
                target_w_tile_bytes=2 << 20, n_split=None):
    """Stream the LM head over vocab tiles; return (logits?, lse[B,1])."""
    B, H = pooled.shape
    Hw, V = w.shape
    assert H == Hw

    # --- batch tiling: as few batch tiles as possible (W is re-streamed once
    #     per batch tile); pad Bp to a multiple of t_b (sublane multiple of 8).
    n_b = -(-B // 512)                       # <=512 rows per batch tile
    t_b = _round_up(-(-B // n_b), 8)
    Bp = n_b * t_b
    if Bp != B:
        pooled = jnp.pad(pooled, ((0, Bp - B), (0, 0)))

    # --- vocab tiling by W-tile bytes (keeps DMA >> per-step overhead and
    #     the double-buffered tile inside every generation's VMEM budget).
    if v_tile is None:
        v_tile = _pick_v_tile(H, V, w.dtype.itemsize, target_w_tile_bytes)
    assert V % v_tile == 0, "v_tile must divide V"
    n_v_total = V // v_tile

    # --- split the vocab reduction across a leading parallel axis so both
    #     TensorCores (v7x megacore) stream half of W even at small batch.
    if n_split is None:
        n_split = 2 if (n_v_total >= 2 and n_v_total % 2 == 0) else 1
    assert n_v_total % n_split == 0
    n_v = n_v_total // n_split

    grid = (n_split, n_b, n_v)               # vocab (reduction) axis last

    pooled_spec = pl.BlockSpec((t_b, H), lambda s, b, v: (b, 0))
    w_spec = pl.BlockSpec((H, v_tile), lambda s, b, v: (0, s * n_v + v))
    lse_spec = pl.BlockSpec((None, t_b, 1), lambda s, b, v: (s, b, 0))
    lse_shape = jax.ShapeDtypeStruct((n_split, Bp, 1), jnp.float32)

    scratch = [pltpu.VMEM((t_b, 1), jnp.float32),    # running max
               pltpu.VMEM((t_b, 1), jnp.float32)]    # running sum

    # Explicit VMEM budget: double-buffered W + pooled (+ logits out) + slack.
    w_tile_bytes = H * v_tile * w.dtype.itemsize
    out_tile_bytes = t_b * v_tile * 4 if with_logits else 0
    need = (2 * (w_tile_bytes + t_b * H * pooled.dtype.itemsize + out_tile_bytes)
            + 4 * t_b * 4)
    vmem_limit = int(min(max(need + (4 << 20), 16 << 20), 48 << 20))

    cparams = pltpu.CompilerParams(
        dimension_semantics=("parallel", "parallel", "arbitrary"),
        vmem_limit_bytes=vmem_limit)

    cost = pl.CostEstimate(
        flops=2 * Bp * H * V,
        transcendentals=Bp * V,
        bytes_accessed=(n_b * H * V * w.dtype.itemsize     # W re-read / b-tile
                        + Bp * H * pooled.dtype.itemsize
                        + n_split * Bp * 4
                        + (Bp * V * 4 if with_logits else 0)))

    if with_logits:
        logits_spec = pl.BlockSpec((t_b, v_tile),
                                   lambda s, b, v: (b, s * n_v + v))
        logits, lse_parts = pl.pallas_call(
            _logits_lse_kernel,
            out_shape=(jax.ShapeDtypeStruct((Bp, V), jnp.float32), lse_shape),
            grid_spec=pltpu.PrefetchScalarGridSpec(
                num_scalar_prefetch=0,
                grid=grid,
                in_specs=[pooled_spec, w_spec],
                out_specs=(logits_spec, lse_spec),
                scratch_shapes=scratch),
            compiler_params=cparams,
            cost_estimate=cost,
        )(pooled, w)
    else:
        logits = None
        lse_parts = pl.pallas_call(
            _lse_kernel,
            out_shape=lse_shape,
            grid_spec=pltpu.PrefetchScalarGridSpec(
                num_scalar_prefetch=0,
                grid=grid,
                in_specs=[pooled_spec, w_spec],
                out_specs=lse_spec,
                scratch_shapes=scratch),
            compiler_params=cparams,
            cost_estimate=cost,
        )(pooled, w)

    # Combine the per-split partial LSEs (tiny [n_split, Bp, 1]) in JAX.
    lse = jax.nn.logsumexp(lse_parts, axis=0)[:B]            # [B, 1]
    if with_logits:
        return logits[:B], lse
    return lse


def llm_candidate_logprobs(pooled, w, candidates, *, v_tile=None,
                           target_w_tile_bytes=2 << 20):
    """pooled [B,H] bf16, w [H,V] bf16, candidates [B,C] i32 -> [B,C] f32."""
    lse = _stream_lse(pooled, w, v_tile=v_tile, with_logits=False,
                      target_w_tile_bytes=target_w_tile_bytes)
    # Candidate gather hoisted out of the vocab loop: per-row gather of the C
    # candidate columns of W (tiny) + f32-accumulated einsum.
    # TODO(synk): candidate ids outside [0, V) are clipped by jnp.take.
    w_cand = jnp.take(w.T, candidates, axis=0)               # [B, C, H] bf16
    cand_logits = jnp.einsum('bh,bch->bc', pooled, w_cand,
                             preferred_element_type=jnp.float32)
    return cand_logits - lse                                  # [B, C]


def llm_full_logprobs(pooled, w, *, v_tile=None, target_w_tile_bytes=2 << 20):
    """pooled [B,H] bf16, w [H,V] bf16 -> [B,V] f32 log-probs."""
    logits, lse = _stream_lse(pooled, w, v_tile=v_tile, with_logits=True,
                              target_w_tile_bytes=target_w_tile_bytes)
    return logits - lse


# ----------------------------------------------------------------------------
# module stand-in
# ----------------------------------------------------------------------------
class BaseLLMPallas:
    """Minimal concrete stand-in for lamorel BaseLLM on TPU."""

    def __init__(self, vocab_size=512, hidden=32, seed=0):
        self.vocab_size = vocab_size
        self.hidden = hidden
        k1, k2 = jax.random.split(jax.random.PRNGKey(seed))
        self.embedding = jax.random.normal(
            k1, (vocab_size, hidden), jnp.float32) * 0.02
        # bf16 LM head: halves W bytes on the (dominant) HBM stream and is the
        # native MXU input dtype on v5e/v6e/v7x.
        self.lm_head = (jax.random.normal(
            k2, (hidden, vocab_size), jnp.float32) * 0.02).astype(jnp.bfloat16)

    def forward(self, module_function_keys, contexts, candidates=None,
                require_grad=False, v_tile=None, **kwargs):
        # contexts: [B, S] int32 token ids
        x = jnp.take(self.embedding, contexts, axis=0)        # [B, S, H]
        # TODO(synk): masked / length-normalized pooling if contexts carry pad.
        pooled = jnp.mean(x, axis=1).astype(jnp.bfloat16)      # [B, H]
        if candidates is None:
            return llm_full_logprobs(pooled, self.lm_head, v_tile=v_tile)
        return llm_candidate_logprobs(pooled, self.lm_head, candidates,
                                      v_tile=v_tile)

    def get_trainable_module(self):
        return None


# ----------------------------------------------------------------------------
# self-test
# ----------------------------------------------------------------------------
if __name__ == "__main__":
    B, S, H, V, C = 2, 8, 32, 512, 4
    key = jax.random.PRNGKey(0)
    k_ctx, k_cand = jax.random.split(key)
    contexts = jax.random.randint(k_ctx, (B, S), 0, V, dtype=jnp.int32)
    candidates = jax.random.randint(k_cand, (B, C), 0, V, dtype=jnp.int32)

    llm = BaseLLMPallas(vocab_size=V, hidden=H, seed=0)

    # v_tile=128 forces 4 vocab tiles -> 2 splits x 2 tiles each, exercising
    # the online LSE, the W streaming and the split-combine even at toy sizes.
    scores = llm.forward(["__score"], contexts, candidates=candidates,
                         v_tile=128)
    scores = jax.block_until_ready(scores)

    full_lp = llm.forward(["__score"], contexts, candidates=None, v_tile=128)
    full_lp = jax.block_until_ready(full_lp)

    # Reference in plain JAX (same bf16 inputs, f32 accumulation).
    x = jnp.take(llm.embedding, contexts, axis=0)
    pooled = jnp.mean(x, axis=1).astype(jnp.bfloat16)
    logits = jnp.dot(pooled, llm.lm_head, preferred_element_type=jnp.float32)
    ref_lp = jax.nn.log_softmax(logits, axis=-1)
    ref_scores = jnp.take_along_axis(ref_lp, candidates, axis=1)

    assert scores.shape == (B, C)
    assert full_lp.shape == (B, V)
    assert jnp.allclose(scores, ref_scores, atol=1e-4, rtol=1e-4), \
        "candidate-score mismatch vs ref"
    assert jnp.allclose(full_lp, ref_lp, atol=1e-4, rtol=1e-4), \
        "full-vocab log-prob mismatch vs ref"

    print("KERNEL_OK")
</pallas_src>

<mosaic_0001>
module attributes {stable_mosaic.version = 11 : i64} {
  func.func @_lse_kernel(%arg0: i32, %arg1: i32, %arg2: i32, %arg3: memref<8x32xbf16, #tpu.memory_space<vmem>>, %arg4: memref<32x128xbf16, #tpu.memory_space<vmem>>, %arg5: memref<1x8x1xf32, #tpu.memory_space<vmem>>, %arg6: memref<8x1xf32, #tpu.memory_space<vmem>>, %arg7: memref<8x1xf32, #tpu.memory_space<vmem>>) attributes {dimension_semantics = [#tpu.dimension_semantics<parallel>, #tpu.dimension_semantics<parallel>, #tpu.dimension_semantics<arbitrary>], iteration_bounds = array<i64: 2, 1, 2>, scalar_prefetch = 0 : i64, scratch_operands = 2 : i64, tpu.core_type = #tpu.core_type<tc>, window_params = [{transform_indices = @transform_0, window_bounds = array<i64: 8, 32>}, {transform_indices = @transform_1, window_bounds = array<i64: 32, 128>}, {transform_indices = @transform_2, window_bounds = array<i64: 1, 8, 1>}]} {
    %c0_i32 = arith.constant 0 : i32
    %0 = arith.cmpi eq, %arg2, %c0_i32 : i32
    %1 = arith.extui %0 : i1 to i32
    %c0_i32_0 = arith.constant 0 : i32
    %2 = arith.cmpi ne, %1, %c0_i32_0 : i32
    scf.if %2 {
      %cst_15 = arith.constant 0xFF800000 : f32
      %25 = vector.broadcast %cst_15 : f32 to vector<8x1xf32>
      %c0_16 = arith.constant 0 : index
      %c0_17 = arith.constant 0 : index
      %26 = vector.load %arg6[%c0_16, %c0_17] : memref<8x1xf32, #tpu.memory_space<vmem>>, vector<8x1xf32>
      tpu.vector_store %arg6[%c0_16, %c0_17], %25 {strides = array<i32>} : memref<8x1xf32, #tpu.memory_space<vmem>>, vector<8x1xf32>,
      %cst_18 = arith.constant 0.000000e+00 : f32
      %27 = vector.broadcast %cst_18 : f32 to vector<8x1xf32>
      %c0_19 = arith.constant 0 : index
      %c0_20 = arith.constant 0 : index
      %28 = vector.load %arg7[%c0_19, %c0_20] : memref<8x1xf32, #tpu.memory_space<vmem>>, vector<8x1xf32>
      tpu.vector_store %arg7[%c0_19, %c0_20], %27 {strides = array<i32>} : memref<8x1xf32, #tpu.memory_space<vmem>>, vector<8x1xf32>,
    } else {
    }
    %c0 = arith.constant 0 : index
    %c0_1 = arith.constant 0 : index
    %3 = vector.load %arg3[%c0, %c0_1] : memref<8x32xbf16, #tpu.memory_space<vmem>>, vector<8x32xbf16>
    %c0_2 = arith.constant 0 : index
    %c0_3 = arith.constant 0 : index
    %4 = vector.load %arg4[%c0_2, %c0_3] : memref<32x128xbf16, #tpu.memory_space<vmem>>, vector<32x128xbf16>
    %cst = arith.constant dense<0.000000e+00> : vector<8x128xf32>
    %5 = tpu.matmul %3, %4, %cst {dimension_numbers = #tpu.dot_dimension_numbers<[1], [0], [0], [1], [0, 0, 1, 1], [], []>} : vector<8x32xbf16>, vector<32x128xbf16>, vector<8x128xf32> -> vector<8x128xf32>
    %c0_4 = arith.constant 0 : index
    %c0_5 = arith.constant 0 : index
    %6 = vector.load %arg6[%c0_4, %c0_5] : memref<8x1xf32, #tpu.memory_space<vmem>>, vector<8x1xf32>
    %cst_6 = arith.constant dense<0xFF800000> : vector<8xf32>
    %7 = vector.multi_reduction <maximumf>, %5, %cst_6 [1] : vector<8x128xf32> to vector<8xf32>
    %8 = vector.shape_cast %7 : vector<8xf32> to vector<8x1xf32>
    %9 = arith.maximumf %6, %8 : vector<8x1xf32>
    %c0_7 = arith.constant 0 : index
    %c0_8 = arith.constant 0 : index
    %10 = vector.load %arg7[%c0_7, %c0_8] : memref<8x1xf32, #tpu.memory_space<vmem>>, vector<8x1xf32>
    %11 = arith.subf %6, %9 : vector<8x1xf32>
    %12 = math.exp %11 : vector<8x1xf32>
    %13 = arith.mulf %10, %12 : vector<8x1xf32>
    %14 = vector.broadcast %9 : vector<8x1xf32> to vector<8x128xf32>
    %15 = arith.subf %5, %14 : vector<8x128xf32>
    %16 = math.exp %15 : vector<8x128xf32>
    %cst_9 = arith.constant dense<0.000000e+00> : vector<8xf32>
    %17 = vector.multi_reduction <add>, %16, %cst_9 [1] : vector<8x128xf32> to vector<8xf32>
    %18 = vector.shape_cast %17 : vector<8xf32> to vector<8x1xf32>
    %19 = arith.addf %13, %18 : vector<8x1xf32>
    %c0_10 = arith.constant 0 : index
    %c0_11 = arith.constant 0 : index
    %20 = vector.load %arg7[%c0_10, %c0_11] : memref<8x1xf32, #tpu.memory_space<vmem>>, vector<8x1xf32>
    tpu.vector_store %arg7[%c0_10, %c0_11], %19 {strides = array<i32>} : memref<8x1xf32, #tpu.memory_space<vmem>>, vector<8x1xf32>,
    %c0_12 = arith.constant 0 : index
    %c0_13 = arith.constant 0 : index
    %21 = vector.load %arg6[%c0_12, %c0_13] : memref<8x1xf32, #tpu.memory_space<vmem>>, vector<8x1xf32>
    tpu.vector_store %arg6[%c0_12, %c0_13], %9 {strides = array<i32>} : memref<8x1xf32, #tpu.memory_space<vmem>>, vector<8x1xf32>,
    %c1_i32 = arith.constant 1 : i32
    %22 = arith.cmpi eq, %arg2, %c1_i32 : i32
    %23 = arith.extui %22 : i1 to i32
    %c0_i32_14 = arith.constant 0 : i32
    %24 = arith.cmpi ne, %23, %c0_i32_14 : i32
    scf.if %24 {
      %c0_15 = arith.constant 0 : index
      %c0_16 = arith.constant 0 : index
      %25 = vector.load %arg6[%c0_15, %c0_16] : memref<8x1xf32, #tpu.memory_space<vmem>>, vector<8x1xf32>
      %c0_17 = arith.constant 0 : index
      %c0_18 = arith.constant 0 : index
      %26 = vector.load %arg7[%c0_17, %c0_18] : memref<8x1xf32, #tpu.memory_space<vmem>>, vector<8x1xf32>
      %27 = math.log %26 : vector<8x1xf32>
      %28 = arith.addf %25, %27 : vector<8x1xf32>
      %c0_19 = arith.constant 0 : index
      %c0_20 = arith.constant 0 : index
      %c0_21 = arith.constant 0 : index
      %29 = vector.load %arg5[%c0_19, %c0_20, %c0_21] : memref<1x8x1xf32, #tpu.memory_space<vmem>>, vector<1x8x1xf32>
      %30 = vector.shape_cast %29 : vector<1x8x1xf32> to vector<8x1xf32>
      %31 = vector.shape_cast %28 : vector<8x1xf32> to vector<1x8x1xf32>
      tpu.vector_store %arg5[%c0_19, %c0_20, %c0_21], %31 {strides = array<i32>} : memref<1x8x1xf32, #tpu.memory_space<vmem>>, vector<1x8x1xf32>,
    } else {
    }
    return
  }
  func.func @transform_0(%arg0: i32, %arg1: i32, %arg2: i32) -> (i32, i32) {
    %c0_i32 = arith.constant 0 : i32
    %c0_i32_0 = arith.constant 0 : i32
    return %arg1, %c0_i32 : i32, i32
  }
  func.func @transform_1(%arg0: i32, %arg1: i32, %arg2: i32) -> (i32, i32) {
    %c2_i32 = arith.constant 2 : i32
    %0 = arith.muli %arg0, %c2_i32 : i32
    %1 = arith.addi %0, %arg2 : i32
    %c0_i32 = arith.constant 0 : i32
    %c0_i32_0 = arith.constant 0 : i32
    return %c0_i32, %1 : i32, i32
  }
  func.func @transform_2(%arg0: i32, %arg1: i32, %arg2: i32) -> (i32, i32, i32) {
    %c0_i32 = arith.constant 0 : i32
    %c0_i32_0 = arith.constant 0 : i32
    return %arg0, %arg1, %c0_i32 : i32, i32, i32
  }
}

</mosaic_0001>

<bundles_post_ra>
// kernel: tpu_custom_call.1
= control target key start
LH: loop header
LB: loop body
LE: loop exit
PB: predicated region body
PF: predicated region fallthrough
CT: control target
= control target key end

     0   :  { %7 = vsyncpa [#allocation5], 0  ;;  %s904_s0 = inlined_call_operand.hbm [shape: bf16[8,32], index: 0, kind: input, shape index: {}]   ;;  %s905_s1 = inlined_call_operand.hbm [shape: bf16[32,512], index: 1, kind: input, shape index: {}]   ;;  %s906_s2 = inlined_call_operand.vmem [shape: f32[2,8,1], index: 2, kind: output, shape index: {}]  }
   0x1   :  { %8 = vsyncpa [#allocation7], 0 }
   0x2   :  { %10 = vsyncpa [#allocation7 + $0x1], 0  ;;  %s709_s9 = smov 0   ;;  %s711_s10 = smov 0  }
   0x3   :  { %s713_s11 = smov 0   ;;  %s715_s12 = smov 0  }
   0x4   :  { %s717_s13 = smov 0   ;;  %s719_s14 = smov 0  }
   0x5   :  { %s721_s15 = smov 0   ;;  %s723_s16 = smov 0  }
   0x6 LB: > { %s423_s17 = sadd.s32 4294967295, %s682_s16   ;;  %s72_s18 = sadd.s32 1, %s662_s11  ;;  %s682_s16 = sphi %s723_s16, %s16_s16   ;;  %s678_s15 = sphi %s721_s15, %s929_s15   ;;  %s674_s14 = sphi %s719_s14, %s928_s14   ;;  %s670_s13 = sphi %s717_s13, %s927_s13   ;;  %s666_s12 = sphi %s715_s12, %s926_s12   ;;  %s662_s11 = sphi %s713_s11, %s925_s11   ;;  %s658_s10 = sphi %s711_s10, %s924_s10   ;;  %s654_s9 = sphi %s709_s9, %s923_s9  }
   0x7   : > { %p79_p0 = scmp.ne.s32.totalorder %s662_s11, %s658_s10  ;;  %p80_p1 = scmp.eq.s32.totalorder %s682_s16, 0 }
   0x8   : > { %p85_p2 = scmp.ne.s32.totalorder %s658_s10, %s654_s9  ;;  %p753_p3 = scmp.eq.s32.totalorder %s423_s17, 0 }
   0x9   : > { %p81_p4 = por %p80_p1, %p79_p0  ;;  %p427_p5 = scmp.ge.s32.totalorder %s682_s16, 1 }
   0xa   : > { %s912_s19 = scalar_select %p753_p3, 1, 0 }
   0xb   : > { %p760_p6 = por %p753_p3, %p85_p2  ;;  %p124_p7 = scmp.lt.s32.totalorder %s682_s16, 5 }
   0xc   : > { %s684_s22 = smov [#allocation4]   ;;  %p470_p10 = scmp.lt.s32.totalorder %s682_s16, 4 }
   0xd   : > { %s913_s20 = scalar_select %p760_p6, 1, 0 }
   0xe   : > { %p765_p8 = pnand %p427_p5, %p124_p7  ;;  %s139_s23 = sshll.u32 %s684_s22, 4  ;;  %s140_s23 = int_to_ptr.vmem [resolvable:$true] %s139_s23 }
   0xf   : > { %p778_p12 = pnand %p470_p10, %p81_p4  ;;  %s554_s28 = scalar_lea.hbm %s904_s0, 64 }
  0x10   : > { %s914_s21 = scalar_select %p765_p8, 1, 0 }
  0x11   : > { %p461_p9 = pneg %p765_p8  ;;  %p555_p13 = scmp.ne.s32.totalorder %s904_s0, %s554_s28 }
  0x12   : > { %s916_s25 = scalar_select %p778_p12, 1, 0 }
  0x13   : > { %p774_p11 = pnand %p461_p9, %p753_p3  ;;  %p561_p5 = scmp.lt.u32.totalorder %s554_s28, %s904_s0 }
  0x15   : > { %p556_p0 = pneg %p774_p11 }
  0x17   : > { %p557_p1 = pnand %p556_p0, %p555_p13 }
  0x19   : > { %p558_p2 = pneg %p557_p1 }
  0x1b   : > { %p563_p4 = pnand %p561_p5, %p558_p2 }
  0x1d   : > { %566 = shalt.err (!%p563_p4)
}
  0x1e   : > { %s567_s5 = scalar_lea.vmem %s140_s23, 64  ;;  %p575_p6 = scmp.lt.s32.totalorder %s140_s23, %s140_s23 }
  0x1f   : > { %p568_p7 = scmp.ne.s32.totalorder %s140_s23, %s567_s5  ;;  %p576_p3 = scmp.lt.s32.totalorder %s567_s5, %s567_s5 }
  0x21   : > { %p570_p9 = pnand %p568_p7, %p556_p0  ;;  %p577_p8 = por %p576_p3, %p575_p6 }
  0x23   : > { %p571_p10 = pneg %p570_p9 }
  0x25   : > { %p578_p12 = pnand %p577_p8, %p571_p10 }
  0x27   : > { %581 = shalt.err (!%p578_p12)
}
  0x28   : > { %464 = dma.hbm_to_vmem [thread:$0]  (!%p774_p11), %s904_s0, 64, %s140_s23, [#allocation5]  }
  0x29   : > { %s28_s8 = sadd.s32 1, %s674_s14  ;;  %s35_s9 = sadd.s32 1, %s678_s15 }
  0x2a   : > { %p29_p13 = scmp.ge.s32.totalorder %s28_s8, 2  ;;  %s425_s17 = sshll.u32 %s678_s15, 1 }
  0x2b   : > { %s66_s22 = sadd.s32 %s674_s14, %s425_s17  ;;  %s150_s26 = sand.u32 1, %s662_s11  }
  0x2c   : > { %s931_s8 = smov (%p29_p13, %s28_s8), 0  ;;  %s933_s9 = smov (!%p29_p13, %s35_s9), %s678_s15 }
  0x2d   : > { %s430_s24 = sshll.u32 %s150_s26, 4  ;;  %p37_p3 = scmp.ge.s32.totalorder %s933_s9, 2 }
  0x2e   : > { %s432_s27 = sshll.u32 %s66_s22, 6  ;;  %s154_s28 = scalar_lea.vmem [#allocation6], %s430_s24 }
  0x2f   : > { %s162_s29 = sshll.u32 %s154_s28, 4  ;;  %s935_s9 = smov (%p37_p3, %s933_s9), 0  ;;  %s813_s29 = int_to_ptr.vmem [resolvable:$true] %s162_s29 }
  0x30   : > { %s811_s3 = scalar_lea.hbm %s905_s1, %s432_s27  ;;  %s426_s4 = sshll.u32 %s935_s9, 1 }
  0x31   : > { %s68_s5 = sadd.s32 %s426_s4, %s931_s8  ;;  %s821_s17 = scalar_lea.sflag [#allocation7], %s150_s26 }
  0x32   : > { %s69_s6 = ssub.s32 %s66_s22, %s68_s5  ;;  %s582_s24 = scalar_lea.hbm %s811_s3, 256 }
  0x33   : > { %p817_p6 = scmp.eq.s32.totalorder %s69_s6, 0  ;;  %p583_p8 = scmp.ne.s32.totalorder %s811_s3, %s582_s24 }
  0x34   : > { %p918_p11 = scmp.ne.s32.totalorder %s916_s25, 0  ;;  %s587_s23 = scalar_lea.hbm %s905_s1, 1024 }
  0x35   : > { %p588_p2 = scmp.lt.u32.totalorder %s811_s3, %s905_s1  ;;  %p589_p5 = scmp.lt.u32.totalorder %s587_s23, %s582_s24 }
  0x36   : > { %p584_p12 = pneg %p918_p11  ;;  %p591_p7 = scmp.lt.u32.totalorder %s582_s24, %s811_s3 }
  0x37   : > { %p590_p4 = por %p589_p5, %p588_p2 }
  0x38   : > { %p585_p0 = pnand %p584_p12, %p583_p8 }
  0x39   : > { %p592_p9 = por %p591_p7, %p590_p4 }
  0x3a   : > { %p586_p1 = pneg %p585_p0 }
  0x3c   : > { %p593_p10 = pnand %p592_p9, %p586_p1 }
  0x3e   : > { %596 = shalt.err (!%p593_p10)
}
  0x3f   : > { %s597_s26 = scalar_lea.vmem %s813_s29, 256  ;;  %s685_s4 = smov [#allocation6]  }
  0x40   : > { %p598_p13 = scmp.ne.s32.totalorder %s813_s29, %s597_s26  ;;  %s602_s5 = sshll.u32 %s685_s4, 4  ;;  %s603_s5 = int_to_ptr.vmem [resolvable:$false] %s602_s5 }
  0x41   : > { %s604_s6 = scalar_lea.vmem %s603_s5, 512  ;;  %p605_p0 = scmp.lt.s32.totalorder %s813_s29, %s603_s5 }
  0x42   : > { %p600_p3 = pnand %p598_p13, %p584_p12  ;;  %p606_p2 = scmp.lt.s32.totalorder %s604_s6, %s597_s26 }
  0x44   : > { %p601_p8 = pneg %p600_p3  ;;  %p607_p5 = por %p606_p2, %p605_p0 }
  0x46   : > { %p608_p4 = pnand %p607_p5, %p601_p8 }
  0x48   : > { %611 = shalt.err (!%p608_p4)
}
  0x49   : > { %s686_s24 = smov 256   ;;  %s687_s27 = smov 64  }
  0x4a   : > { %s688_s28 = smov 4   ;;  %p919_p12 = scmp.ne.s32.totalorder %s914_s21, 0 }
  0x4b   : > { %468 = dma.hbm_to_vmem [thread:$0]  (!%p918_p11), %s811_s3, 256, %s813_s29, %s821_s17, %s686_s24, %s687_s27, %s688_s28  }
  0x4c   : > { %s854_s23 = scalar_select %p817_p6, %s662_s11, %s72_s18  }
  0x4d   : > { %174 = sbr.rel (%p919_p12) target bundleno = 774 (0x306), region = 28  ;;  %p920_p1 = scmp.ne.s32.totalorder (!%p919_p12), %s912_s19, 0 }
  0x54   : > { %645 = dma.done.wait (%p920_p1), [#allocation5], 64  }
  0x55   : > { %647 = vsyncadd (%p920_p1), [#allocation5], 4294967232  ;;  %s180_s30 = sand.u32 1, %s658_s10   ;;  %p921_p11 = scmp.ne.s32.totalorder %s913_s20, 0 }
  0x56   : > { %s435_s22 = sshll.u32 %s180_s30, 4  ;;  %s181_s26 = scalar_lea.sflag [#allocation7], %s180_s30 }
  0x57   : > { %s184_s25 = scalar_lea.vmem [#allocation6], %s435_s22 }
  0x58   : > { %649 = dma.done.wait (%p921_p11), %s181_s26, 256  }
  0x59   : > { %651 = vsyncadd (%p921_p11), %s181_s26, 4294967040  ;;  %p209_p6 = scmp.lt.s32.totalorder %s670_s13, 1  ;;  %p437_p7 = scmp.ne.s32.totalorder %s666_s12, 0 }
  0x5a   : > { %vm221_vm0 = vcmask (!%p437_p7), 7168   ;;  %v689_v0 = vmov (!%p437_p7), -inf   ;;  %v690_v1 = vmov (!%p437_p7), 0.0  }
  0x5b   : > { %s937_s13 = smov (!%p209_p6, %s670_s13), 1  ;;  %220 = sbr.rel (%p437_p7) target bundleno = 98 (0x62), region = 40 }
  0x5c   : > { %s436_s18 = sshll.u32 %s937_s13, 3  ;;  %222 = vst.msk [vmem:[#allocation2] sm:$0xff] (!%p437_p7), %vm221_vm0, %v689_v0  ;;  %223 = vst.msk [vmem:[#allocation3] sm:$0xff] (!%p437_p7), %vm221_vm0, %v690_v1 }
  0x5d   : > { %s872_s19 = scalar_lea.vmem %s906_s2, %s436_s18 }
  0x62 PF: > { %v546_v2 = vld [vmem:[%s184_s25] sm:$0xff]   ;;  %v691_v3 = vmov 0.0   ;;  %v547_v4 = vld [vmem:[%s184_s25 + $0x8] sm:$0xff]   ;;  %vm692_vm1 = vmmov 0   ;;  %vm241_vm2 = vcmask 261120   ;;  %v693_v10 = vmov 0  }
  0x63   : > { %447 = vmatprep.subr.bf16.mxu0 %v691_v3  ;;  %451 = vmatprep.mubr.msk.bf16.mxu0 %vm692_vm1, %v691_v3  ;;  %v224_v5 = vld [vmem:[#allocation4] sm:$0xf]  ;;  %v285_v11 = vld [vmem:[#allocation2] sm:$0xff]  ;;  %vm305_vm3 = vcmask 7168   ;;  %v289_v21 = vld [vmem:[#allocation3] sm:$0xff]  ;;  %p441_p9 = scmp.ne.s32.totalorder %s666_s12, 1 }
  0x64   : > { %448 = vmatpush3.bf16.msra.mxu0 %v546_v2  ;;  %545 = vset.pattern.permute.xlu0 %v693_v10 }
  0x65   : > { %449 = vmatprep.subr.bf16.mxu0 %v691_v3 }
  0x68   : > { %450 = vmatpush3.bf16.msra.mxu0 %v547_v4 }
  0x6b   : > { %452 = vmatmul.mubr.msk.bf16.vlgmr.msra.gmra.mrb[0].mxu0 %vm241_vm2, %v224_v5 }
 0x13e   : > { %v279_v6 = vpop.f32.mrb[0].mxu0 }
 0x13f   : > { %286 = vmax.xlane.f32.xlu0 %v279_v6  ;;  %v453_v7 = vpop.f32.mrb[1].mxu0 }
 0x140   : > { %v282_v8 = vpop.f32.mrb[2].mxu0 }
 0x141   : > { %v454_v9 = vpop.f32.mrb[3].mxu0 }
 0x1cc   : > { %v287_v12 = vpop.xlane.xlu0 %286 }
 0x1cd   : > { %v288_v13 = vmax.f32 %v285_v11, %v287_v12 }
 0x1cf   : > { %v290_v14 = vsub.f32 %v285_v11, %v288_v13  ;;  %307 = vst.msk [vmem:[#allocation2] sm:$0xff] %vm305_vm3, %v288_v13  ;;  %296 = vperm.xlu0 %545, %v288_v13  }
 0x1d1   : > { %v291_v19 = vmul.f32 1.442695, %v290_v14 }
 0x1d6   : > { %v312_v27 = vld [vmem:[#allocation2] sm:$0xff] (!%p441_p9) }
 0x24e   : > { %v297_v15 = vpop.permute.xlu0 %296 }
 0x24f   : > { %v299_v16 = vsub.f32 %v279_v6, %v297_v15 }
 0x251   : > { %v300_v17 = vmul.f32 1.442695, %v299_v16 }
 0x253   : > { %548 = vpow2.f32 %v300_v17 }
 0x254   : > { %550 = vpow2.f32 %v291_v19 }
 0x25d   : > { %v549_v18 = vpop.eup %548 }
 0x25e   : > { %302 = vadd.xlane.f32.xlu1 %v549_v18  ;;  %v551_v20 = vpop.eup %550 }
 0x25f   : > { %v293_v22 = vmul.f32 %v551_v20, %v289_v21 }
 0x2e8   : > { %311 = sbr.rel (%p441_p9) target bundleno = 774 (0x306), region = 44 }
 0x2eb   : > { %v303_v23 = vpop.xlane.xlu1 %302 }
 0x2ec   : > { %v304_v24 = vadd.f32 %v303_v23, %v293_v22 }
 0x2ee   : > { %306 = vst.msk [vmem:[#allocation3] sm:$0xff] %vm305_vm3, %v304_v24 }
 0x2f5   : > { %v313_v25 = vld [vmem:[#allocation3] sm:$0xff] }
 0x2f6   : > { %552 = vlog2.f32 %v313_v25 }
 0x300   : > { %v553_v26 = vpop.eup %552 }
 0x301   : > { %v315_v28 = vmul.f32 0.6931472, %v553_v26 }
 0x303   : > { %v316_v29 = vadd.f32 %v315_v28, %v312_v27 }
 0x305   : > { %317 = vst.msk [vmem:[%s872_s19] sm:$0xff] %vm305_vm3, %v316_v29 }
 0x306 PF: > { %s16_s16 = sadd.s32 1, %s682_s16   ;;  %s922_s20 = smov %s935_s9 }
 0x307   : > { %p13_p10 = scmp.ge.s32.totalorder %s16_s16, 6   ;;  %s923_s9 = smov %s658_s10 }
 0x308   : > { %s924_s10 = smov %s662_s11  ;;  %s925_s11 = smov %s854_s23 }
 0x309   : > { %s926_s12 = smov %s674_s14  ;;  %s927_s13 = smov %s678_s15 }
 0x30a   : > { %s928_s14 = smov %s931_s8  ;;  %s929_s15 = smov %s922_s20 }
 0x30b   :  { %15 = sbr.rel (!%p13_p10) target bundleno = 6 (0x6), region = 82 }
 0x312   :  { %343 = vsyncpa [#allocation5], 1 }
 0x313   :  { %345 = vsyncpa [#allocation5 + $0x1], 1 }
 0x314   :  { %346 = vsyncpa [#allocation7], 1 }
 0x315   :  { %348 = vsyncpa [#allocation7 + $0x1], 1 }

</bundles_post_ra>
